<compile_context>
chip_gen: v7x
topology: tpu7x:2x2x1
jax: 0.10.0
libtpu: 0.0.40
codegen_flags: <defaults>
</compile_context>

<pallas_src>
import math
from functools import partial

import jax
import jax.numpy as jnp
from jax.experimental import pallas as pl
from jax.experimental.pallas import tpu as pltpu


def _mha_kernel(batch_tile, seq_len, num_heads, head_dim,
                x_ref, wqkv_ref, bqkv_ref, wo_ref, bo_ref, o_ref):
    embed_dim = num_heads * head_dim
    rows = batch_tile * seq_len
    d_in = x_ref.shape[-1]

    # ---- fused QKV projection: one (Bb*S, D_in) x (D_in, 3E) MXU matmul ----
    xf = x_ref[...].reshape(rows, d_in)
    qkv = jnp.dot(xf, wqkv_ref[...], preferred_element_type=jnp.float32)
    qkv = qkv + bqkv_ref[...]                       # (1, 3E) lane-dense bias row

    # Wrapper permuted the weight columns: contiguous q | k | v thirds,
    # heads contiguous inside each third.
    scale = 1.0 / math.sqrt(head_dim)
    q_all = qkv[:, :embed_dim] * scale              # fold softmax scale into q once
    k_all = qkv[:, embed_dim:2 * embed_dim]
    v_all = qkv[:, 2 * embed_dim:]

    # Per-head attention, accumulated straight into the output projection:
    #   out += softmax(q_h k_h^T / sqrt(hd)) v_h @ W_o[h*hd:(h+1)*hd, :]
    acc = jnp.zeros((rows, embed_dim), jnp.float32)
    for h in range(num_heads):
        lo, hi = h * head_dim, (h + 1) * head_dim
        qh = q_all[:, lo:hi].reshape(batch_tile, seq_len, head_dim)
        kh = k_all[:, lo:hi].reshape(batch_tile, seq_len, head_dim)
        vh = v_all[:, lo:hi].reshape(batch_tile, seq_len, head_dim)

        # Batched over the batch tile; contracts head_dim directly (no k.T).
        s = jnp.einsum('bqd,bkd->bqk', qh, kh,
                       preferred_element_type=jnp.float32)      # (Bb, S, S)
        m = jnp.max(s, axis=-1, keepdims=True)
        p = jnp.exp(s - m)
        l = jnp.sum(p, axis=-1, keepdims=True)
        pv = jnp.einsum('bqk,bkd->bqd', p, vh,
                        preferred_element_type=jnp.float32)     # (Bb, S, hd)
        # Fuse the softmax denominator into the small (S, hd) result (EUP recip).
        pv = pv * pl.reciprocal(l, approx=True)

        acc = acc + jnp.dot(pv.reshape(rows, head_dim), wo_ref[lo:hi, :],
                            preferred_element_type=jnp.float32)

    out = acc + bo_ref[...]                          # (1, E) lane-dense bias row
    o_ref[...] = out.reshape(batch_tile, seq_len, embed_dim).astype(o_ref.dtype)


def _pick_batch_tile(batch, seq_len, target_rows=256):
    """Largest divisor of `batch` whose flattened row count ~fills the MXU M-dim."""
    bb = min(batch, max(1, target_rows // max(seq_len, 1)))
    while batch % bb:
        bb -= 1
    return bb


def multihead_attention(x, w_qkv, b_qkv, w_o, b_o, num_heads):
    """x: [B, S, D_in], w_qkv: [D_in, 3E], b_qkv: [3E], w_o: [E, E], b_o: [E].

    Weights are stored transposed relative to PyTorch ([in, out]); the qkv
    column order matches nn.Linear(input_dim, 3*embed_dim) + the module's
    reshape(B, S, H, 3*hd) semantics (per head: q, k, v).
    """
    B, S, D_in = x.shape
    three_e = w_qkv.shape[1]
    embed_dim = three_e // 3
    assert embed_dim % num_heads == 0
    head_dim = embed_dim // num_heads

    # --- wrapper-side layout plumbing (outside the kernel) ---
    # Permute QKV columns from PyTorch's (head, {q,k,v}, d) interleave to
    # ({q,k,v}, head, d) so the kernel splits contiguous thirds.
    j = jnp.arange(three_e)
    part, rem = j // embed_dim, j % embed_dim
    h_idx, d_idx = rem // head_dim, rem % head_dim
    old_col = h_idx * 3 * head_dim + part * head_dim + d_idx
    w_qkv_p = w_qkv[:, old_col]
    b_qkv_p = b_qkv[old_col].reshape(1, three_e)     # lane-dense 2-D bias
    b_o_2d = b_o.reshape(1, embed_dim)

    batch_tile = _pick_batch_tile(B, S)
    grid = (B // batch_tile,)

    kernel = partial(_mha_kernel, batch_tile, S, num_heads, head_dim)

    return pl.pallas_call(
        kernel,
        out_shape=jax.ShapeDtypeStruct((B, S, embed_dim), x.dtype),
        grid_spec=pltpu.PrefetchScalarGridSpec(
            num_scalar_prefetch=0,
            grid=grid,
            in_specs=[
                pl.BlockSpec((batch_tile, S, D_in), lambda b: (b, 0, 0)),
                # Weights / biases stay resident across the grid (constant maps).
                pl.BlockSpec((D_in, three_e), lambda b: (0, 0)),
                pl.BlockSpec((1, three_e), lambda b: (0, 0)),
                pl.BlockSpec((embed_dim, embed_dim), lambda b: (0, 0)),
                pl.BlockSpec((1, embed_dim), lambda b: (0, 0)),
            ],
            out_specs=pl.BlockSpec((batch_tile, S, embed_dim),
                                   lambda b: (b, 0, 0)),
        ),
        compiler_params=pltpu.CompilerParams(
            dimension_semantics=("parallel",),
        ),
    )(x, w_qkv_p, b_qkv_p, w_o, b_o_2d)


def _xavier_uniform(key, shape_out_in):
    # Matches nn.init.xavier_uniform_ on a weight of shape (out, in).
    fan_out, fan_in = shape_out_in
    bound = math.sqrt(6.0 / (fan_in + fan_out))
    return jax.random.uniform(key, shape_out_in, jnp.float32, -bound, bound)


def _reference(x, w_qkv, b_qkv, w_o, b_o, num_heads):
    # Pure-JAX reference replicating the PyTorch forward (default mask=None).
    B, S, D_in = x.shape
    E = w_o.shape[0]
    hd = E // num_heads
    qkv = x @ w_qkv + b_qkv                                 # (B, S, 3E)
    qkv = qkv.reshape(B, S, num_heads, 3 * hd)
    qkv = jnp.transpose(qkv, (0, 2, 1, 3))                  # (B, H, S, 3hd)
    q, k, v = jnp.split(qkv, 3, axis=-1)
    logits = jnp.einsum("bhqd,bhkd->bhqk", q, k) / math.sqrt(hd)
    attn = jax.nn.softmax(logits, axis=-1)
    vals = jnp.einsum("bhqk,bhkd->bhqd", attn, v)           # (B, H, S, hd)
    vals = jnp.transpose(vals, (0, 2, 1, 3)).reshape(B, S, E)
    return vals @ w_o + b_o


if __name__ == "__main__":
    # Small shapes consistent with the module: batch=2, seq=8, input_dim=embed_dim=32, heads=4.
    B, S, D_IN, E, H = 2, 8, 32, 32, 4

    key = jax.random.PRNGKey(0)
    kx, kq, ko = jax.random.split(key, 3)

    x = jax.random.normal(kx, (B, S, D_IN), dtype=jnp.float32)

    # Deterministic parameter init (mirrors _reset_parameters):
    #   xavier_uniform_ weights, zero biases.  Stored transposed ([in, out]).
    w_qkv = _xavier_uniform(kq, (3 * E, D_IN)).T            # (D_IN, 3E)
    b_qkv = jnp.zeros((3 * E,), jnp.float32)
    w_o = _xavier_uniform(ko, (E, E)).T                     # (E, E)
    b_o = jnp.zeros((E,), jnp.float32)

    out = multihead_attention(x, w_qkv, b_qkv, w_o, b_o, num_heads=H)
    out = jax.block_until_ready(out)

    ref = _reference(x, w_qkv, b_qkv, w_o, b_o, num_heads=H)
    assert out.shape == (B, S, E)
    # Tolerance covers the approximate EUP reciprocal in the fused softmax.
    assert jnp.allclose(out, ref, atol=2e-3, rtol=2e-3), "mismatch vs reference"

    print("KERNEL_OK")
</pallas_src>

<mosaic_0001>
module attributes {stable_mosaic.version = 11 : i64} {
  func.func @_mha_kernel(%arg0: i32, %arg1: memref<2x8x32xf32, #tpu.memory_space<vmem>>, %arg2: memref<32x96xf32, #tpu.memory_space<vmem>>, %arg3: memref<1x96xf32, #tpu.memory_space<vmem>>, %arg4: memref<32x32xf32, #tpu.memory_space<vmem>>, %arg5: memref<1x32xf32, #tpu.memory_space<vmem>>, %arg6: memref<2x8x32xf32, #tpu.memory_space<vmem>>) attributes {dimension_semantics = [#tpu.dimension_semantics<parallel>], iteration_bounds = array<i64: 1>, scalar_prefetch = 0 : i64, scratch_operands = 0 : i64, tpu.core_type = #tpu.core_type<tc>, window_params = [{transform_indices = @transform_0, window_bounds = array<i64: 2, 8, 32>}, {pipeline_mode = #tpu.pipeline_mode<synchronous>, transform_indices = @transform_1, window_bounds = array<i64: 32, 96>}, {pipeline_mode = #tpu.pipeline_mode<synchronous>, transform_indices = @transform_2, window_bounds = array<i64: 1, 96>}, {pipeline_mode = #tpu.pipeline_mode<synchronous>, transform_indices = @transform_3, window_bounds = array<i64: 32, 32>}, {pipeline_mode = #tpu.pipeline_mode<synchronous>, transform_indices = @transform_4, window_bounds = array<i64: 1, 32>}, {transform_indices = @transform_5, window_bounds = array<i64: 2, 8, 32>}]} {
    %c0 = arith.constant 0 : index
    %c0_0 = arith.constant 0 : index
    %c0_1 = arith.constant 0 : index
    %0 = vector.load %arg1[%c0, %c0_0, %c0_1] : memref<2x8x32xf32, #tpu.memory_space<vmem>>, vector<2x8x32xf32>
    %1 = vector.shape_cast %0 : vector<2x8x32xf32> to vector<16x32xf32>
    %c0_2 = arith.constant 0 : index
    %c0_3 = arith.constant 0 : index
    %2 = vector.load %arg2[%c0_2, %c0_3] : memref<32x96xf32, #tpu.memory_space<vmem>>, vector<32x96xf32>
    %cst = arith.constant dense<0.000000e+00> : vector<16x96xf32>
    %3 = tpu.matmul %1, %2, %cst {dimension_numbers = #tpu.dot_dimension_numbers<[1], [0], [0], [1], [0, 0, 1, 1], [], []>} : vector<16x32xf32>, vector<32x96xf32>, vector<16x96xf32> -> vector<16x96xf32>
    %c0_4 = arith.constant 0 : index
    %c0_5 = arith.constant 0 : index
    %4 = vector.load %arg3[%c0_4, %c0_5] : memref<1x96xf32, #tpu.memory_space<vmem>>, vector<1x96xf32>
    %5 = vector.broadcast %4 : vector<1x96xf32> to vector<16x96xf32>
    %6 = arith.addf %3, %5 : vector<16x96xf32>
    %7 = vector.extract_strided_slice %6 {offsets = [0, 0], sizes = [16, 32], strides = [1, 1]} : vector<16x96xf32> to vector<16x32xf32>
    %cst_6 = arith.constant 0.353553385 : f32
    %8 = vector.broadcast %cst_6 : f32 to vector<16x32xf32>
    %9 = arith.mulf %7, %8 : vector<16x32xf32>
    %10 = vector.extract_strided_slice %6 {offsets = [0, 32], sizes = [16, 32], strides = [1, 1]} : vector<16x96xf32> to vector<16x32xf32>
    %11 = vector.extract_strided_slice %6 {offsets = [0, 64], sizes = [16, 32], strides = [1, 1]} : vector<16x96xf32> to vector<16x32xf32>
    %cst_7 = arith.constant 0.000000e+00 : f32
    %12 = vector.broadcast %cst_7 : f32 to vector<16x32xf32>
    %13 = vector.extract_strided_slice %9 {offsets = [0, 0], sizes = [16, 8], strides = [1, 1]} : vector<16x32xf32> to vector<16x8xf32>
    %14 = vector.shape_cast %13 : vector<16x8xf32> to vector<2x8x8xf32>
    %15 = vector.extract_strided_slice %10 {offsets = [0, 0], sizes = [16, 8], strides = [1, 1]} : vector<16x32xf32> to vector<16x8xf32>
    %16 = vector.shape_cast %15 : vector<16x8xf32> to vector<2x8x8xf32>
    %17 = vector.extract_strided_slice %11 {offsets = [0, 0], sizes = [16, 8], strides = [1, 1]} : vector<16x32xf32> to vector<16x8xf32>
    %18 = vector.shape_cast %17 : vector<16x8xf32> to vector<2x8x8xf32>
    "tpu.trace_start"() <{level = 10 : i32, message = "bqd,bkd->bqk"}> : () -> ()
    %cst_8 = arith.constant dense<0.000000e+00> : vector<2x8x8xf32>
    %19 = tpu.matmul %14, %16, %cst_8 {dimension_numbers = #tpu.dot_dimension_numbers<[2], [2], [1], [1], [0, 0, 0, 1, 1, 1], [0], [0]>} : vector<2x8x8xf32>, vector<2x8x8xf32>, vector<2x8x8xf32> -> vector<2x8x8xf32>
    "tpu.trace_stop"() : () -> ()
    %cst_9 = arith.constant dense<0xFF800000> : vector<2x8xf32>
    %20 = vector.multi_reduction <maximumf>, %19, %cst_9 [2] : vector<2x8x8xf32> to vector<2x8xf32>
    %21 = vector.shape_cast %20 : vector<2x8xf32> to vector<2x8x1xf32>
    %22 = vector.broadcast %21 : vector<2x8x1xf32> to vector<2x8x8xf32>
    %23 = arith.subf %19, %22 : vector<2x8x8xf32>
    %24 = math.exp %23 : vector<2x8x8xf32>
    %cst_10 = arith.constant dense<0.000000e+00> : vector<2x8xf32>
    %25 = vector.multi_reduction <add>, %24, %cst_10 [2] : vector<2x8x8xf32> to vector<2x8xf32>
    %26 = vector.shape_cast %25 : vector<2x8xf32> to vector<2x8x1xf32>
    "tpu.trace_start"() <{level = 10 : i32, message = "bqk,bkd->bqd"}> : () -> ()
    %cst_11 = arith.constant dense<0.000000e+00> : vector<2x8x8xf32>
    %27 = tpu.matmul %24, %18, %cst_11 {dimension_numbers = #tpu.dot_dimension_numbers<[2], [1], [1], [2], [0, 0, 0, 1, 1, 2], [0], [0]>} : vector<2x8x8xf32>, vector<2x8x8xf32>, vector<2x8x8xf32> -> vector<2x8x8xf32>
    "tpu.trace_stop"() : () -> ()
    %28 = tpu.reciprocal %26 {approx = true} : vector<2x8x1xf32> -> vector<2x8x1xf32>
    %29 = vector.broadcast %28 : vector<2x8x1xf32> to vector<2x8x8xf32>
    %30 = arith.mulf %27, %29 : vector<2x8x8xf32>
    %31 = vector.shape_cast %30 : vector<2x8x8xf32> to vector<16x8xf32>
    %c0_12 = arith.constant 0 : index
    %c0_13 = arith.constant 0 : index
    %32 = vector.load %arg4[%c0_12, %c0_13] : memref<32x32xf32, #tpu.memory_space<vmem>>, vector<8x32xf32>
    %cst_14 = arith.constant dense<0.000000e+00> : vector<16x32xf32>
    %33 = tpu.matmul %31, %32, %cst_14 {dimension_numbers = #tpu.dot_dimension_numbers<[1], [0], [0], [1], [0, 0, 1, 1], [], []>} : vector<16x8xf32>, vector<8x32xf32>, vector<16x32xf32> -> vector<16x32xf32>
    %34 = arith.addf %12, %33 : vector<16x32xf32>
    %35 = vector.extract_strided_slice %9 {offsets = [0, 8], sizes = [16, 8], strides = [1, 1]} : vector<16x32xf32> to vector<16x8xf32>
    %36 = vector.shape_cast %35 : vector<16x8xf32> to vector<2x8x8xf32>
    %37 = vector.extract_strided_slice %10 {offsets = [0, 8], sizes = [16, 8], strides = [1, 1]} : vector<16x32xf32> to vector<16x8xf32>
    %38 = vector.shape_cast %37 : vector<16x8xf32> to vector<2x8x8xf32>
    %39 = vector.extract_strided_slice %11 {offsets = [0, 8], sizes = [16, 8], strides = [1, 1]} : vector<16x32xf32> to vector<16x8xf32>
    %40 = vector.shape_cast %39 : vector<16x8xf32> to vector<2x8x8xf32>
    "tpu.trace_start"() <{level = 10 : i32, message = "bqd,bkd->bqk"}> : () -> ()
    %cst_15 = arith.constant dense<0.000000e+00> : vector<2x8x8xf32>
    %41 = tpu.matmul %36, %38, %cst_15 {dimension_numbers = #tpu.dot_dimension_numbers<[2], [2], [1], [1], [0, 0, 0, 1, 1, 1], [0], [0]>} : vector<2x8x8xf32>, vector<2x8x8xf32>, vector<2x8x8xf32> -> vector<2x8x8xf32>
    "tpu.trace_stop"() : () -> ()
    %cst_16 = arith.constant dense<0xFF800000> : vector<2x8xf32>
    %42 = vector.multi_reduction <maximumf>, %41, %cst_16 [2] : vector<2x8x8xf32> to vector<2x8xf32>
    %43 = vector.shape_cast %42 : vector<2x8xf32> to vector<2x8x1xf32>
    %44 = vector.broadcast %43 : vector<2x8x1xf32> to vector<2x8x8xf32>
    %45 = arith.subf %41, %44 : vector<2x8x8xf32>
    %46 = math.exp %45 : vector<2x8x8xf32>
    %cst_17 = arith.constant dense<0.000000e+00> : vector<2x8xf32>
    %47 = vector.multi_reduction <add>, %46, %cst_17 [2] : vector<2x8x8xf32> to vector<2x8xf32>
    %48 = vector.shape_cast %47 : vector<2x8xf32> to vector<2x8x1xf32>
    "tpu.trace_start"() <{level = 10 : i32, message = "bqk,bkd->bqd"}> : () -> ()
    %cst_18 = arith.constant dense<0.000000e+00> : vector<2x8x8xf32>
    %49 = tpu.matmul %46, %40, %cst_18 {dimension_numbers = #tpu.dot_dimension_numbers<[2], [1], [1], [2], [0, 0, 0, 1, 1, 2], [0], [0]>} : vector<2x8x8xf32>, vector<2x8x8xf32>, vector<2x8x8xf32> -> vector<2x8x8xf32>
    "tpu.trace_stop"() : () -> ()
    %50 = tpu.reciprocal %48 {approx = true} : vector<2x8x1xf32> -> vector<2x8x1xf32>
    %51 = vector.broadcast %50 : vector<2x8x1xf32> to vector<2x8x8xf32>
    %52 = arith.mulf %49, %51 : vector<2x8x8xf32>
    %53 = vector.shape_cast %52 : vector<2x8x8xf32> to vector<16x8xf32>
    %c8 = arith.constant 8 : index
    %c0_19 = arith.constant 0 : index
    %54 = vector.load %arg4[%c8, %c0_19] : memref<32x32xf32, #tpu.memory_space<vmem>>, vector<8x32xf32>
    %cst_20 = arith.constant dense<0.000000e+00> : vector<16x32xf32>
    %55 = tpu.matmul %53, %54, %cst_20 {dimension_numbers = #tpu.dot_dimension_numbers<[1], [0], [0], [1], [0, 0, 1, 1], [], []>} : vector<16x8xf32>, vector<8x32xf32>, vector<16x32xf32> -> vector<16x32xf32>
    %56 = arith.addf %34, %55 : vector<16x32xf32>
    %57 = vector.extract_strided_slice %9 {offsets = [0, 16], sizes = [16, 8], strides = [1, 1]} : vector<16x32xf32> to vector<16x8xf32>
    %58 = vector.shape_cast %57 : vector<16x8xf32> to vector<2x8x8xf32>
    %59 = vector.extract_strided_slice %10 {offsets = [0, 16], sizes = [16, 8], strides = [1, 1]} : vector<16x32xf32> to vector<16x8xf32>
    %60 = vector.shape_cast %59 : vector<16x8xf32> to vector<2x8x8xf32>
    %61 = vector.extract_strided_slice %11 {offsets = [0, 16], sizes = [16, 8], strides = [1, 1]} : vector<16x32xf32> to vector<16x8xf32>
    %62 = vector.shape_cast %61 : vector<16x8xf32> to vector<2x8x8xf32>
    "tpu.trace_start"() <{level = 10 : i32, message = "bqd,bkd->bqk"}> : () -> ()
    %cst_21 = arith.constant dense<0.000000e+00> : vector<2x8x8xf32>
    %63 = tpu.matmul %58, %60, %cst_21 {dimension_numbers = #tpu.dot_dimension_numbers<[2], [2], [1], [1], [0, 0, 0, 1, 1, 1], [0], [0]>} : vector<2x8x8xf32>, vector<2x8x8xf32>, vector<2x8x8xf32> -> vector<2x8x8xf32>
    "tpu.trace_stop"() : () -> ()
    %cst_22 = arith.constant dense<0xFF800000> : vector<2x8xf32>
    %64 = vector.multi_reduction <maximumf>, %63, %cst_22 [2] : vector<2x8x8xf32> to vector<2x8xf32>
    %65 = vector.shape_cast %64 : vector<2x8xf32> to vector<2x8x1xf32>
    %66 = vector.broadcast %65 : vector<2x8x1xf32> to vector<2x8x8xf32>
    %67 = arith.subf %63, %66 : vector<2x8x8xf32>
    %68 = math.exp %67 : vector<2x8x8xf32>
    %cst_23 = arith.constant dense<0.000000e+00> : vector<2x8xf32>
    %69 = vector.multi_reduction <add>, %68, %cst_23 [2] : vector<2x8x8xf32> to vector<2x8xf32>
    %70 = vector.shape_cast %69 : vector<2x8xf32> to vector<2x8x1xf32>
    "tpu.trace_start"() <{level = 10 : i32, message = "bqk,bkd->bqd"}> : () -> ()
    %cst_24 = arith.constant dense<0.000000e+00> : vector<2x8x8xf32>
    %71 = tpu.matmul %68, %62, %cst_24 {dimension_numbers = #tpu.dot_dimension_numbers<[2], [1], [1], [2], [0, 0, 0, 1, 1, 2], [0], [0]>} : vector<2x8x8xf32>, vector<2x8x8xf32>, vector<2x8x8xf32> -> vector<2x8x8xf32>
    "tpu.trace_stop"() : () -> ()
    %72 = tpu.reciprocal %70 {approx = true} : vector<2x8x1xf32> -> vector<2x8x1xf32>
    %73 = vector.broadcast %72 : vector<2x8x1xf32> to vector<2x8x8xf32>
    %74 = arith.mulf %71, %73 : vector<2x8x8xf32>
    %75 = vector.shape_cast %74 : vector<2x8x8xf32> to vector<16x8xf32>
    %c16 = arith.constant 16 : index
    %c0_25 = arith.constant 0 : index
    %76 = vector.load %arg4[%c16, %c0_25] : memref<32x32xf32, #tpu.memory_space<vmem>>, vector<8x32xf32>
    %cst_26 = arith.constant dense<0.000000e+00> : vector<16x32xf32>
    %77 = tpu.matmul %75, %76, %cst_26 {dimension_numbers = #tpu.dot_dimension_numbers<[1], [0], [0], [1], [0, 0, 1, 1], [], []>} : vector<16x8xf32>, vector<8x32xf32>, vector<16x32xf32> -> vector<16x32xf32>
    %78 = arith.addf %56, %77 : vector<16x32xf32>
    %79 = vector.extract_strided_slice %9 {offsets = [0, 24], sizes = [16, 8], strides = [1, 1]} : vector<16x32xf32> to vector<16x8xf32>
    %80 = vector.shape_cast %79 : vector<16x8xf32> to vector<2x8x8xf32>
    %81 = vector.extract_strided_slice %10 {offsets = [0, 24], sizes = [16, 8], strides = [1, 1]} : vector<16x32xf32> to vector<16x8xf32>
    %82 = vector.shape_cast %81 : vector<16x8xf32> to vector<2x8x8xf32>
    %83 = vector.extract_strided_slice %11 {offsets = [0, 24], sizes = [16, 8], strides = [1, 1]} : vector<16x32xf32> to vector<16x8xf32>
    %84 = vector.shape_cast %83 : vector<16x8xf32> to vector<2x8x8xf32>
    "tpu.trace_start"() <{level = 10 : i32, message = "bqd,bkd->bqk"}> : () -> ()
    %cst_27 = arith.constant dense<0.000000e+00> : vector<2x8x8xf32>
    %85 = tpu.matmul %80, %82, %cst_27 {dimension_numbers = #tpu.dot_dimension_numbers<[2], [2], [1], [1], [0, 0, 0, 1, 1, 1], [0], [0]>} : vector<2x8x8xf32>, vector<2x8x8xf32>, vector<2x8x8xf32> -> vector<2x8x8xf32>
    "tpu.trace_stop"() : () -> ()
    %cst_28 = arith.constant dense<0xFF800000> : vector<2x8xf32>
    %86 = vector.multi_reduction <maximumf>, %85, %cst_28 [2] : vector<2x8x8xf32> to vector<2x8xf32>
    %87 = vector.shape_cast %86 : vector<2x8xf32> to vector<2x8x1xf32>
    %88 = vector.broadcast %87 : vector<2x8x1xf32> to vector<2x8x8xf32>
    %89 = arith.subf %85, %88 : vector<2x8x8xf32>
    %90 = math.exp %89 : vector<2x8x8xf32>
    %cst_29 = arith.constant dense<0.000000e+00> : vector<2x8xf32>
    %91 = vector.multi_reduction <add>, %90, %cst_29 [2] : vector<2x8x8xf32> to vector<2x8xf32>
    %92 = vector.shape_cast %91 : vector<2x8xf32> to vector<2x8x1xf32>
    "tpu.trace_start"() <{level = 10 : i32, message = "bqk,bkd->bqd"}> : () -> ()
    %cst_30 = arith.constant dense<0.000000e+00> : vector<2x8x8xf32>
    %93 = tpu.matmul %90, %84, %cst_30 {dimension_numbers = #tpu.dot_dimension_numbers<[2], [1], [1], [2], [0, 0, 0, 1, 1, 2], [0], [0]>} : vector<2x8x8xf32>, vector<2x8x8xf32>, vector<2x8x8xf32> -> vector<2x8x8xf32>
    "tpu.trace_stop"() : () -> ()
    %94 = tpu.reciprocal %92 {approx = true} : vector<2x8x1xf32> -> vector<2x8x1xf32>
    %95 = vector.broadcast %94 : vector<2x8x1xf32> to vector<2x8x8xf32>
    %96 = arith.mulf %93, %95 : vector<2x8x8xf32>
    %97 = vector.shape_cast %96 : vector<2x8x8xf32> to vector<16x8xf32>
    %c24 = arith.constant 24 : index
    %c0_31 = arith.constant 0 : index
    %98 = vector.load %arg4[%c24, %c0_31] : memref<32x32xf32, #tpu.memory_space<vmem>>, vector<8x32xf32>
    %cst_32 = arith.constant dense<0.000000e+00> : vector<16x32xf32>
    %99 = tpu.matmul %97, %98, %cst_32 {dimension_numbers = #tpu.dot_dimension_numbers<[1], [0], [0], [1], [0, 0, 1, 1], [], []>} : vector<16x8xf32>, vector<8x32xf32>, vector<16x32xf32> -> vector<16x32xf32>
    %100 = arith.addf %78, %99 : vector<16x32xf32>
    %c0_33 = arith.constant 0 : index
    %c0_34 = arith.constant 0 : index
    %101 = vector.load %arg5[%c0_33, %c0_34] : memref<1x32xf32, #tpu.memory_space<vmem>>, vector<1x32xf32>
    %102 = vector.broadcast %101 : vector<1x32xf32> to vector<16x32xf32>
    %103 = arith.addf %100, %102 : vector<16x32xf32>
    %104 = vector.shape_cast %103 : vector<16x32xf32> to vector<2x8x32xf32>
    %c0_35 = arith.constant 0 : index
    %c0_36 = arith.constant 0 : index
    %c0_37 = arith.constant 0 : index
    %105 = vector.load %arg6[%c0_35, %c0_36, %c0_37] : memref<2x8x32xf32, #tpu.memory_space<vmem>>, vector<2x8x32xf32>
    tpu.vector_store %arg6[%c0_35, %c0_36, %c0_37], %104 {strides = array<i32>} : memref<2x8x32xf32, #tpu.memory_space<vmem>>, vector<2x8x32xf32>,
    return
  }
  func.func @transform_0(%arg0: i32) -> (i32, i32, i32) {
    %c0_i32 = arith.constant 0 : i32
    %c0_i32_0 = arith.constant 0 : i32
    %c0_i32_1 = arith.constant 0 : i32
    return %arg0, %c0_i32, %c0_i32_0 : i32, i32, i32
  }
  func.func @transform_1(%arg0: i32) -> (i32, i32) {
    %c0_i32 = arith.constant 0 : i32
    %c0_i32_0 = arith.constant 0 : i32
    %c0_i32_1 = arith.constant 0 : i32
    return %c0_i32, %c0_i32_0 : i32, i32
  }
  func.func @transform_2(%arg0: i32) -> (i32, i32) {
    %c0_i32 = arith.constant 0 : i32
    %c0_i32_0 = arith.constant 0 : i32
    %c0_i32_1 = arith.constant 0 : i32
    return %c0_i32, %c0_i32_0 : i32, i32
  }
  func.func @transform_3(%arg0: i32) -> (i32, i32) {
    %c0_i32 = arith.constant 0 : i32
    %c0_i32_0 = arith.constant 0 : i32
    %c0_i32_1 = arith.constant 0 : i32
    return %c0_i32, %c0_i32_0 : i32, i32
  }
  func.func @transform_4(%arg0: i32) -> (i32, i32) {
    %c0_i32 = arith.constant 0 : i32
    %c0_i32_0 = arith.constant 0 : i32
    %c0_i32_1 = arith.constant 0 : i32
    return %c0_i32, %c0_i32_0 : i32, i32
  }
  func.func @transform_5(%arg0: i32) -> (i32, i32, i32) {
    %c0_i32 = arith.constant 0 : i32
    %c0_i32_0 = arith.constant 0 : i32
    %c0_i32_1 = arith.constant 0 : i32
    return %arg0, %c0_i32, %c0_i32_0 : i32, i32, i32
  }
}

</mosaic_0001>

<bundles_post_ra>
// kernel: tpu_custom_call.1
= control target key start
LH: loop header
LB: loop body
LE: loop exit
PB: predicated region body
PF: predicated region fallthrough
CT: control target
= control target key end

     0   :  { %10 = vsyncpa [#allocation3], 0  ;;  %s2465_s0 = inlined_call_operand.hbm [shape: f32[2,8,32], index: 0, kind: input, shape index: {}]   ;;  %s2466_s1 = inlined_call_operand.hbm [shape: f32[32,96], index: 1, kind: input, shape index: {}]   ;;  %s2467_s2 = inlined_call_operand.vmem [shape: f32[1,96], index: 2, kind: input, shape index: {}]   ;;  %s2468_s3 = inlined_call_operand.hbm [shape: f32[32,32], index: 3, kind: input, shape index: {}]   ;;  %s2469_s4 = inlined_call_operand.vmem [shape: f32[1,32], index: 4, kind: input, shape index: {}]   ;;  %s2470_s5 = inlined_call_operand.hbm [shape: f32[2,8,32], index: 5, kind: output, shape index: {}]  }
   0x1   :  { %11 = vsyncpa [#allocation6], 0 }
   0x2   :  { %12 = vsyncpa [#allocation4], 0  ;;  %s2197_s18 = smov [#allocation5]   ;;  %s2198_s20 = smov [#allocation2]  }
   0x3   :  { %s30_s19 = sshll.u32 %s2197_s18, 4  ;;  %s18_s21 = sshll.u32 %s2198_s20, 4  ;;  %s31_s19 = int_to_ptr.vmem [resolvable:$true] %s30_s19  ;;  %s2246_s21 = int_to_ptr.vmem [resolvable:$true] %s18_s21 }
   0x4   :  { %s2103_s24 = scalar_lea.hbm %s2466_s1, 512 }
   0x5   :  { %p2104_p0 = scmp.ne.s32.totalorder %s2466_s1, %s2103_s24  ;;  %p2107_p1 = scmp.lt.u32.totalorder %s2103_s24, %s2466_s1 }
   0x7   :  { %p2109_p2 = pnand %p2107_p1, %p2104_p0 }
   0x9   :  { %2112 = shalt.err (!%p2109_p2)
}
   0xa   :  { %s2113_s29 = scalar_lea.vmem %s31_s19, 512  ;;  %p2118_p4 = scmp.lt.s32.totalorder %s31_s19, %s31_s19 }
   0xb   :  { %p2114_p3 = scmp.ne.s32.totalorder %s31_s19, %s2113_s29  ;;  %p2119_p5 = scmp.lt.s32.totalorder %s2113_s29, %s2113_s29 }
   0xd   :  { %p2120_p6 = por %p2119_p5, %p2118_p4 }
   0xf   :  { %p2121_p7 = pnand %p2120_p6, %p2114_p3 }
  0x11   :  { %2124 = shalt.err (!%p2121_p7)
}
  0x12   :  { %s2199_s30 = smov 128   ;;  %s2200_s6 = smov 8  }
  0x13   :  { %36 = dma.hbm_to_vmem [thread:$0]  %s2466_s1, 512, %s31_s19, [#allocation6], %s2199_s30, %s2199_s30, %s2200_s6  }
  0x14   :  { %s2125_s11 = scalar_lea.hbm %s2465_s0, 256 }
  0x15   :  { %p2126_p8 = scmp.ne.s32.totalorder %s2465_s0, %s2125_s11  ;;  %p2129_p9 = scmp.lt.u32.totalorder %s2125_s11, %s2465_s0 }
  0x17   :  { %p2131_p10 = pnand %p2129_p9, %p2126_p8 }
  0x19   :  { %2134 = shalt.err (!%p2131_p10)
}
  0x1a   :  { %s2135_s16 = scalar_lea.vmem %s2246_s21, 256  ;;  %p2140_p12 = scmp.lt.s32.totalorder %s2246_s21, %s2246_s21 }
  0x1b   :  { %p2136_p11 = scmp.ne.s32.totalorder %s2246_s21, %s2135_s16  ;;  %p2141_p13 = scmp.lt.s32.totalorder %s2135_s16, %s2135_s16 }
  0x1d   :  { %p2142_p0 = por %p2141_p13, %p2140_p12 }
  0x1f   :  { %p2143_p1 = pnand %p2142_p0, %p2136_p11 }
  0x21   :  { %2146 = shalt.err (!%p2143_p1)
}
  0x22   :  { %24 = dma.hbm_to_vmem [thread:$0]  %s2465_s0, 256, %s2246_s21, [#allocation3], %s2199_s30, %s2199_s30, %s2200_s6  }
  0x23   :  { %s2201_s18 = smov [#allocation7]   ;;  %s2147_s23 = scalar_lea.hbm %s2468_s3, 512 }
  0x24   :  { %s44_s19 = sshll.u32 %s2201_s18, 4  ;;  %p2148_p2 = scmp.ne.s32.totalorder %s2468_s3, %s2147_s23  ;;  %s45_s19 = int_to_ptr.vmem [resolvable:$true] %s44_s19 }
  0x25   :  { %p2151_p3 = scmp.lt.u32.totalorder %s2147_s23, %s2468_s3 }
  0x27   :  { %p2153_p4 = pnand %p2151_p3, %p2148_p2 }
  0x29   :  { %2156 = shalt.err (!%p2153_p4)
}
  0x2a   :  { %s2157_s28 = scalar_lea.vmem %s45_s19, 512  ;;  %p2162_p6 = scmp.lt.s32.totalorder %s45_s19, %s45_s19 }
  0x2b   :  { %p2158_p5 = scmp.ne.s32.totalorder %s45_s19, %s2157_s28  ;;  %p2163_p7 = scmp.lt.s32.totalorder %s2157_s28, %s2157_s28 }
  0x2d   :  { %p2164_p8 = por %p2163_p7, %p2162_p6 }
  0x2f   :  { %p2165_p9 = pnand %p2164_p8, %p2158_p5 }
  0x31   :  { %2168 = shalt.err (!%p2165_p9)
}
  0x32   :  { %50 = dma.hbm_to_vmem [thread:$0]  %s2468_s3, 512, %s45_s19, [#allocation6], %s2199_s30, %s2199_s30, %s2200_s6  }
  0x33   :  { %2191 = dma.done.wait [#allocation3], 256  }
  0x34   :  { %2192 = vsyncadd [#allocation3], 4294967040 }
  0x35   :  { %2193 = dma.done.wait [#allocation6], 1024  }
  0x36   :  { %2194 = vsyncadd [#allocation6], 4294966272  ;;  %vm75_vm0 = vcmask 261120   ;;  %v64_v0 = vld [vmem:[#allocation5] sm:$0xff]  ;;  %v65_v1 = vld [vmem:[#allocation5 + $0x8] sm:$0xff]  ;;  %v2202_v8 = vmov 0.0  }
  0x37   :  { %v66_v2 = vld [vmem:[#allocation5 + $0x10] sm:$0xff]  ;;  %v2038_v3 = vpack.c.bf16 %v65_v1, %v64_v0  ;;  %v67_v4 = vld [vmem:[#allocation5 + $0x18] sm:$0xff]  ;;  %1938 = vmatprep.subr.mxu1 %v2202_v8  ;;  %vm2203_vm1 = vmmov 0   ;;  %s2204_s7 = smov 96   ;;  %s2205_s8 = smov 64   ;;  %vm162_vm2 = vcmask 64512  }
  0x38   :  { %v62_v5 = vld [vmem:[#allocation2] sm:$0xff]  ;;  %v2042_v6 = vpack.c.bf16 %v67_v4, %v66_v2  ;;  %v63_v7 = vld [vmem:[#allocation2 + $0x8] sm:$0xff]  ;;  %1940 = vmatprep.mubr.msk.f32.mxu1 %vm2203_vm1, %v2202_v8  ;;  %s2206_s9 = smov 88   ;;  %s2208_s10 = smov 56   ;;  %v821_v4 = vld [vmem:[#allocation7 + $0x8] sm:$0xff] }
  0x39   :  { %1935 = vmatprep.mubr.msk.f32.mxu0 %vm75_vm0, %v62_v5  ;;  %2039 = vmatprep.subr.bf16.mxu0 %v2038_v3  ;;  %v1841_v9 = vld [vmem:[%s2467_s2] ss:$0 sm:$0xff]  ;;  %s2207_s2 = smov 120   ;;  %s2209_s11 = smov 80   ;;  %v490_v5 = vld [vmem:[#allocation7] sm:$0xff] }
  0x3a   :  { %2041 = vmatpush3.bf16.msra.mxu0 %v2038_v3  ;;  %s2210_s12 = smov 112   ;;  %s2211_s13 = smov 48  }
  0x3b   :  { %2043 = vmatprep.subr.bf16.mxu0 %v2042_v6  ;;  %s2212_s14 = smov 72   ;;  %s2213_s15 = smov 104  }
  0x3c   :  { %s2214_s16 = smov 40   ;;  %s2215_s18 = smov [#allocation8]  }
  0x3d   :  { %s1828_s19 = sshll.u32 %s2215_s18, 4  ;;  %s1829_s19 = int_to_ptr.vmem [resolvable:$true] %s1828_s19 }
  0x3e   :  { %2045 = vmatpush3.bf16.msra.mxu0 %v2042_v6  ;;  %s2169_s20 = scalar_lea.vmem %s1829_s19, 256  ;;  %p2174_p11 = scmp.lt.s32.totalorder %s1829_s19, %s1829_s19 }
  0x3f   :  { %1958 = vmatprep.subr.mxu0 %v2202_v8  ;;  %p2170_p10 = scmp.ne.s32.totalorder %s1829_s19, %s2169_s20  ;;  %p2175_p12 = scmp.lt.s32.totalorder %s2169_s20, %s2169_s20 }
  0x41   :  { %1936 = vmatmul.mubr.msk.f32.vlgmr.msra.gmra.mrb[0].mxu0 %vm75_vm0, %v63_v7  ;;  %p2176_p13 = por %p2175_p12, %p2174_p11 }
  0x42   :  { %1960 = vmatprep.mubr.msk.f32.mxu0 %vm2203_vm1, %v2202_v8 }
  0x43   :  { %p2177_p0 = pnand %p2176_p13, %p2170_p10 }
 0x114   :  { %v1937_v10 = vpop.f32.mrb[0].mxu0 }
 0x115   :  { %v148_v11 = vpop.f32.mrb[1].mxu0  ;;  %v2312_v13 = vadd.f32 %v1937_v10, %v1841_v9 }
 0x116   :  { %v2309_v12 = vadd.f32 %v1841_v9, %v148_v11 }
 0x117   :  { %v2319_v14 = vmul.f32 0.35355338, %v2312_v13 }
 0x118   :  { %160 = vrot.lane.b32.xlu0 %v2309_v12, %s2204_s7  ;;  %v2324_v15 = vmul.f32 0.35355338, %v2309_v12 }
 0x11c   :  { %239 = vrot.lane.b32.xlu0 %v2312_v13, %s2204_s7 }
 0x120   :  { %334 = vrot.lane.b32.xlu0 %v2309_v12, %s2205_s8 }
 0x124   :  { %571 = vrot.lane.b32.xlu0 %v2312_v13, %s2206_s9 }
 0x128   :  { %569 = vrot.lane.b32.xlu0 %v2319_v14, %s2207_s2 }
 0x12c   :  { %493 = vrot.lane.b32.xlu0 %v2309_v12, %s2206_s9 }
 0x130   :  { %491 = vrot.lane.b32.xlu0 %v2324_v15, %s2207_s2 }
 0x134   :  { %741 = vrot.lane.b32.xlu0 %v2312_v13, %s2208_s10 }
 0x138   :  { %986 = vrot.lane.b32.xlu0 %v2309_v12, %s2209_s11 }
 0x13c   :  { %984 = vrot.lane.b32.xlu0 %v2324_v15, %s2210_s12 }
 0x140   :  { %1064 = vrot.lane.b32.xlu0 %v2312_v13, %s2209_s11 }
 0x144   :  { %1062 = vrot.lane.b32.xlu0 %v2319_v14, %s2210_s12 }
 0x18a   :  { %v161_v16 = vpop.permute.xlu0 %160 }
 0x18b   :  { %1939 = vmatpush3.xpose.msk.msra.mxu1 %vm162_vm2, %v161_v16 }
 0x18c   :  { %1943 = vmatprep.subr.mxu1 %v2202_v8 }
 0x18e   :  { %v240_v17 = vpop.permute.xlu0 %239  ;;  %1941 = vmatmul.mubr.msk.f32.vlgmr.msra.gmra.mrb[0].mxu1 %vm162_vm2, %v2324_v15 }
 0x18f   :  { %1944 = vmatpush3.xpose.msk.msra.mxu1 %vm162_vm2, %v240_v17  ;;  %1945 = vmatprep.mubr.msk.f32.mxu1 %vm2203_vm1, %v2202_v8 }
 0x190   :  { %1948 = vmatprep.subr.mxu1 %v2202_v8 }
 0x192   :  { %v335_v18 = vpop.permute.xlu0 %334  ;;  %1946 = vmatmul.mubr.msk.f32.vlgmr.msra.gmra.mrb[2].mxu1 %vm162_vm2, %v2319_v14 }
 0x193   :  { %1949 = vmatpush3.msra.mxu1 %v335_v18  ;;  %1950 = vmatprep.mubr.msk.f32.mxu1 %vm2203_vm1, %v2202_v8 }
 0x194   :  { %1953 = vmatprep.subr.mxu1 %v2202_v8 }
 0x196   :  { %v572_v19 = vpop.permute.xlu0 %571 }
 0x19a   :  { %v570_v20 = vpop.permute.xlu0 %569 }
 0x19e   :  { %v494_v21 = vpop.permute.xlu0 %493 }
 0x19f   :  { %1959 = vmatpush3.xpose.msk.msra.mxu0 %vm162_vm2, %v494_v21 }
 0x1a0   :  { %1968 = vmatprep.subr.mxu0 %v2202_v8 }
 0x1a2   :  { %v492_v22 = vpop.permute.xlu0 %491 }
 0x1a3   :  { %1961 = vmatmul.mubr.msk.f32.vlgmr.msra.gmra.mrb[2].mxu0 %vm162_vm2, %v492_v22 }
 0x1a4   :  { %1970 = vmatprep.mubr.msk.f32.mxu0 %vm2203_vm1, %v2202_v8 }
 0x1a6   :  { %v742_v43 = vpop.permute.xlu0 %741 }
 0x1aa   :  { %v987_v51 = vpop.permute.xlu0 %986 }
 0x1ae   :  { %v985_v52 = vpop.permute.xlu0 %984 }
 0x1b2   :  { %v1065_v53 = vpop.permute.xlu0 %1064 }
 0x1b6   :  { %v1063_v54 = vpop.permute.xlu0 %1062 }
 0x261   :  { %v234_v23 = vpop.f32.mrb[0].mxu1 }
 0x262   :  { %v1942_v24 = vpop.f32.mrb[1].mxu1  ;;  %v316_v25 = vsel %vm162_vm2, %v234_v23, -inf }
 0x263   :  { %317 = vmax.xlane.f32.xlu1 %v316_v25 }
 0x265   :  { %v312_v26 = vpop.f32.mrb[2].mxu1 }
 0x266   :  { %v1947_v27 = vpop.f32.mrb[3].mxu1  ;;  %v319_v28 = vsel %vm162_vm2, %v312_v26, -inf }
 0x267   :  { %320 = vmax.xlane.f32.xlu1 %v319_v28 }
 0x276   :  { %v565_v29 = vpop.f32.mrb[2].mxu0 }
 0x277   :  { %v1962_v30 = vpop.f32.mrb[3].mxu0  ;;  %v647_v31 = vsel %vm162_vm2, %v565_v29, -inf }
 0x278   :  { %648 = vmax.xlane.f32.xlu0 %v647_v31  ;;  %410 = vrot.lane.b32.xlu1 %v2312_v13, %s2205_s8 }
 0x2f0   :  { %v318_v32 = vpop.xlane.xlu1 %317 }
 0x2f1   :  { %v322_v33 = vsub.f32 %v234_v23, %v318_v32 }
 0x2f3   :  { %v324_v34 = vmul.f32 1.442695, %v322_v33 }
 0x2f4   :  { %v321_v35 = vpop.xlane.xlu1 %320 }
 0x2f5   :  { %2071 = vpow2.f32 %v324_v34  ;;  %v323_v36 = vsub.f32 %v312_v26, %v321_v35 }
 0x2f7   :  { %v326_v37 = vmul.f32 1.442695, %v323_v36 }
 0x2f8   :  { %v411_v39 = vpop.permute.xlu1 %410 }
 0x2f9   :  { %2073 = vpow2.f32 %v326_v37 }
 0x2ff   :  { %v2072_v38 = vpop.eup %2071 }
 0x300   :  { %1951 = vmatmul.mubr.msk.f32.vlgmr.msra.gmra.mrb[4].mxu1 %vm162_vm2, %v2072_v38  ;;  %v328_v40 = vsel %vm162_vm2, %v2072_v38, 0.0 }
 0x301   :  { %1954 = vmatpush3.msra.mxu1 %v411_v39  ;;  %329 = vadd.xlane.f32.xlu0 %v328_v40 }
 0x302   :  { %1955 = vmatprep.mubr.msk.f32.mxu1 %vm2203_vm1, %v2202_v8  ;;  %1963 = vmatprep.subr.mxu1 %v2202_v8 }
 0x303   :  { %v2074_v41 = vpop.eup %2073 }
 0x304   :  { %1956 = vmatmul.mubr.msk.f32.vlgmr.msra.gmra.mrb[6].mxu1 %vm162_vm2, %v2074_v41  ;;  %v331_v42 = vsel %vm162_vm2, %v2074_v41, 0.0 }
 0x305   :  { %332 = vadd.xlane.f32.xlu0 %v331_v42  ;;  %1965 = vmatprep.mubr.msk.f32.mxu1 %vm2203_vm1, %v2202_v8  ;;  %v649_v55 = vpop.xlane.xlu0 %648 }
 0x306   :  { %v653_v56 = vsub.f32 %v565_v29, %v649_v55 }
 0x308   :  { %1964 = vmatpush3.xpose.msk.msra.mxu1 %vm162_vm2, %v572_v19  ;;  %v655_v57 = vmul.f32 1.442695, %v653_v56 }
 0x309   :  { %1973 = vmatprep.subr.mxu1 %v2202_v8 }
 0x30a   :  { %2075 = vpow2.f32 %v655_v57 }
 0x30b   :  { %1966 = vmatmul.mubr.msk.f32.vlgmr.msra.gmra.mrb[8].mxu1 %vm162_vm2, %v570_v20 }
 0x30c   :  { %1974 = vmatpush3.msra.mxu1 %v742_v43  ;;  %1975 = vmatprep.mubr.msk.f32.mxu1 %vm2203_vm1, %v2202_v8 }
 0x30d   :  { %1988 = vmatprep.subr.mxu1 %v2202_v8 }
 0x314   :  { %v2076_v58 = vpop.eup %2075 }
 0x315   :  { %v659_v59 = vsel %vm162_vm2, %v2076_v58, 0.0 }
 0x38e   :  { %v330_v6 = vpop.xlane.xlu0 %329 }
 0x392   :  { %v333_v7 = vpop.xlane.xlu0 %332 }
 0x3d3   :  { %v2371_v44 = vpop.f32.mrb[4].mxu1 }
 0x3d4   :  { %v1952_v45 = vpop.f32.mrb[5].mxu1 }
 0x3d7   :  { %v2373_v46 = vpop.f32.mrb[6].mxu1 }
 0x3d8   :  { %v1957_v47 = vpop.f32.mrb[7].mxu1 }
 0x3de   :  { %v643_v48 = vpop.f32.mrb[8].mxu1 }
 0x3df   :  { %v1967_v49 = vpop.f32.mrb[9].mxu1  ;;  %v650_v50 = vsel %vm162_vm2, %v643_v48, -inf }
 0x3e0   :  { %651 = vmax.xlane.f32.xlu1 %v650_v50 }
 0x3f1   :  { %665 = vrot.lane.b32.xlu1 %v2309_v12, %s2208_s10 }
 0x415   :  { %660 = vadd.xlane.f32.xlu1 %v659_v59 }
 0x426   :  { %1234 = vrot.lane.b32.xlu1 %v2312_v13, %s2211_s13 }
 0x46d   :  { %v652_v60 = vpop.xlane.xlu1 %651 }
 0x46e   :  { %v654_v61 = vsub.f32 %v643_v48, %v652_v60 }
 0x470   :  { %v657_v62 = vmul.f32 1.442695, %v654_v61 }
 0x471   :  { %v666_v63 = vpop.permute.xlu1 %665 }
 0x472   :  { %2077 = vpow2.f32 %v657_v62  ;;  %1969 = vmatpush3.msra.mxu0 %v666_v63 }
 0x473   :  { %1971 = vmatmul.mubr.msk.f32.vlgmr.msra.gmra.mrb[4].mxu0 %vm162_vm2, %v2076_v58  ;;  %1978 = vmatprep.subr.mxu0 %v821_v4 }
 0x474   :  { %1979 = vmatpush3.msra.mxu0 %v821_v4 }
 0x475   :  { %1983 = vmatprep.subr.mxu0 %v490_v5 }
 0x47c   :  { %v2078_v0 = vpop.eup %2077 }
 0x47d   :  { %1976 = vmatmul.mubr.msk.f32.vlgmr.msra.gmra.mrb[10].mxu1 %vm162_vm2, %v2078_v0  ;;  %v662_v1 = vsel %vm162_vm2, %v2078_v0, 0.0 }
 0x47e   :  { %1989 = vmatpush3.xpose.msk.msra.mxu1 %vm162_vm2, %v987_v51  ;;  %663 = vadd.xlane.f32.xlu0 %v662_v1 }
 0x47f   :  { %1990 = vmatprep.mubr.msk.f32.mxu1 %vm2203_vm1, %v2202_v8  ;;  %1993 = vmatprep.subr.mxu1 %v2202_v8 }
 0x481   :  { %1991 = vmatmul.mubr.msk.f32.vlgmr.msra.gmra.mrb[12].mxu1 %vm162_vm2, %v985_v52 }
 0x482   :  { %1994 = vmatpush3.xpose.msk.msra.mxu1 %vm162_vm2, %v1065_v53  ;;  %1995 = vmatprep.mubr.msk.f32.mxu1 %vm2203_vm1, %v2202_v8 }
 0x483   :  { %2003 = vmatprep.subr.mxu1 %v2202_v8 }
 0x485   :  { %1996 = vmatmul.mubr.msk.f32.vlgmr.msra.gmra.mrb[14].mxu1 %vm162_vm2, %v1063_v54 }
 0x486   :  { %2005 = vmatprep.mubr.msk.f32.mxu1 %vm2203_vm1, %v2202_v8 }
 0x4a2   :  { %v661_v2 = vpop.xlane.xlu1 %660 }
 0x4a3   :  { %2079 = vrcp.f32 %v661_v2 }
 0x4a6   :  { %v1235_v3 = vpop.permute.xlu1 %1234 }
 0x4a7   :  { %2004 = vmatpush3.msra.mxu1 %v1235_v3 }
 0x4a8   :  { %2013 = vmatprep.subr.mxu1 %v2202_v8 }
 0x4ad   :  { %v2080_v10 = vpop.eup %2079 }
 0x50b   :  { %v664_v9 = vpop.xlane.xlu0 %663 }
 0x50c   :  { %2081 = vrcp.f32 %v664_v9 }
 0x50d   :  { %2083 = vrcp.f32 %v330_v6 }
 0x50e   :  { %2085 = vrcp.f32 %v333_v7  ;;  %v1728_v7 = vld [vmem:[#allocation7 + $0x18] sm:$0xff] }
 0x516   :  { %v2082_v18 = vpop.eup %2081 }
 0x517   :  { %v2084_v20 = vpop.eup %2083 }
 0x518   :  { %v488_v23 = vmul.f32 %v2084_v20, %v2371_v44  ;;  %v2086_v27 = vpop.eup %2085  ;;  %v1314_v44 = vld [vmem:[#allocation7 + $0x10] sm:$0xff] }
 0x519   :  { %v489_v29 = vmul.f32 %v2086_v27, %v2373_v46 }
 0x546   :  { %v737_v11 = vpop.f32.mrb[4].mxu0 }
 0x547   :  { %v819_v16 = vmul.f32 %v2080_v10, %v737_v11  ;;  %v1972_v17 = vpop.f32.mrb[5].mxu0 }
 0x549   :  { %1980 = vmatprep.mubr.msk.f32.mxu0 %vm162_vm2, %v819_v16 }
 0x550   :  { %v813_v19 = vpop.f32.mrb[10].mxu1 }
 0x551   :  { %v820_v21 = vmul.f32 %v2082_v18, %v813_v19  ;;  %v1977_v22 = vpop.f32.mrb[11].mxu1 }
 0x553   :  { %1981 = vmatmul.mubr.msk.f32.vlgmr.msra.gmra.mrb[6].mxu0 %vm162_vm2, %v820_v21 }
 0x554   :  { %1985 = vmatprep.mubr.msk.f32.mxu0 %vm162_vm2, %v488_v23  ;;  %v1058_v24 = vpop.f32.mrb[12].mxu1  ;;  %1984 = vmatpush3.msra.mxu0 %v490_v5  ;;  %v1876_v23 = vld [vmem:[%s2469_s4] ss:$0 sm:$0xff] }
 0x555   :  { %v1992_v25 = vpop.f32.mrb[13].mxu1  ;;  %v1140_v26 = vsel %vm162_vm2, %v1058_v24, -inf  ;;  %1998 = vmatprep.subr.mxu0 %v2202_v8 }
 0x556   :  { %1141 = vmax.xlane.f32.xlu0 %v1140_v26 }
 0x558   :  { %v1136_v28 = vpop.f32.mrb[14].mxu1 }
 0x559   :  { %v1997_v30 = vpop.f32.mrb[15].mxu1  ;;  %v1143_v31 = vsel %vm162_vm2, %v1136_v28, -inf }
 0x55a   :  { %1144 = vmax.xlane.f32.xlu0 %v1143_v31 }
 0x55b   :  { %1986 = vmatmul.mubr.msk.f32.vlgmr.msra.gmra.mrb[6].mxu0 %vm162_vm2, %v489_v29 }
 0x55c   :  { %2000 = vmatprep.mubr.msk.f32.mxu0 %vm2203_vm1, %v2202_v8 }
 0x570   :  { %1158 = vrot.lane.b32.xlu0 %v2309_v12, %s2211_s13 }
 0x574   :  { %1400 = vrot.lane.b32.xlu0 %v2309_v12, %s2212_s14 }
 0x5e3   :  { %v1142_v32 = vpop.xlane.xlu0 %1141 }
 0x5e4   :  { %v1146_v33 = vsub.f32 %v1058_v24, %v1142_v32 }
 0x5e6   :  { %v1148_v34 = vmul.f32 1.442695, %v1146_v33 }
 0x5e7   :  { %v1145_v35 = vpop.xlane.xlu0 %1144 }
 0x5e8   :  { %2087 = vpow2.f32 %v1148_v34  ;;  %v1147_v36 = vsub.f32 %v1136_v28, %v1145_v35 }
 0x5ea   :  { %v1150_v37 = vmul.f32 1.442695, %v1147_v36 }
 0x5eb   :  { %v1159_v38 = vpop.permute.xlu0 %1158 }
 0x5ec   :  { %2089 = vpow2.f32 %v1150_v37  ;;  %1999 = vmatpush3.msra.mxu0 %v1159_v38 }
 0x5ed   :  { %2008 = vmatprep.subr.mxu0 %v1314_v44 }
 0x5ef   :  { %v1401_v42 = vpop.permute.xlu0 %1400 }
 0x5f2   :  { %v2088_v39 = vpop.eup %2087 }
 0x5f3   :  { %2001 = vmatmul.mubr.msk.f32.vlgmr.msra.gmra.mrb[8].mxu0 %vm162_vm2, %v2088_v39  ;;  %v1152_v40 = vsel %vm162_vm2, %v2088_v39, 0.0 }
 0x5f4   :  { %1153 = vadd.xlane.f32.xlu0 %v1152_v40  ;;  %2009 = vmatpush3.msra.mxu0 %v1314_v44 }
 0x5f5   :  { %2018 = vmatprep.subr.mxu0 %v2202_v8 }
 0x5f6   :  { %v2090_v41 = vpop.eup %2089 }
 0x5f7   :  { %2006 = vmatmul.mubr.msk.f32.vlgmr.msra.gmra.mrb[16].mxu1 %vm162_vm2, %v2090_v41  ;;  %v1155_v43 = vsel %vm162_vm2, %v2090_v41, 0.0 }
 0x5f8   :  { %2014 = vmatpush3.xpose.msk.msra.mxu1 %vm162_vm2, %v1401_v42  ;;  %1156 = vadd.xlane.f32.xlu1 %v1155_v43 }
 0x5f9   :  { %2015 = vmatprep.mubr.msk.f32.mxu1 %vm2203_vm1, %v2202_v8  ;;  %2023 = vmatprep.subr.mxu1 %v2202_v8 }
 0x609   :  { %1478 = vrot.lane.b32.xlu1 %v2312_v13, %s2212_s14 }
 0x60a   :  { %1398 = vrot.lane.b32.xlu0 %v2324_v15, %s2213_s15 }
 0x60e   :  { %1476 = vrot.lane.b32.xlu0 %v2319_v14, %s2213_s15 }
 0x681   :  { %v1154_v45 = vpop.xlane.xlu0 %1153 }
 0x682   :  { %2091 = vrcp.f32 %v1154_v45 }
 0x685   :  { %v1399_v46 = vpop.permute.xlu0 %1398  ;;  %v1157_v47 = vpop.xlane.xlu1 %1156 }
 0x686   :  { %2016 = vmatmul.mubr.msk.f32.vlgmr.msra.gmra.mrb[18].mxu1 %vm162_vm2, %v1399_v46  ;;  %2093 = vrcp.f32 %v1157_v47 }
 0x687   :  { %2025 = vmatprep.mubr.msk.f32.mxu1 %vm2203_vm1, %v2202_v8 }
 0x689   :  { %v1479_v54 = vpop.permute.xlu1 %1478  ;;  %v1477_v55 = vpop.permute.xlu0 %1476 }
 0x68c   :  { %v2092_v48 = vpop.eup %2091 }
 0x690   :  { %v2094_v51 = vpop.eup %2093 }
 0x6c6   :  { %v1230_v49 = vpop.f32.mrb[8].mxu0 }
 0x6c7   :  { %v1312_v50 = vmul.f32 %v2092_v48, %v1230_v49  ;;  %v2002_v15 = vpop.f32.mrb[9].mxu0 }
 0x6c9   :  { %2010 = vmatprep.mubr.msk.f32.mxu0 %vm162_vm2, %v1312_v50 }
 0x6ca   :  { %v1306_v52 = vpop.f32.mrb[16].mxu1 }
 0x6cb   :  { %v1313_v53 = vmul.f32 %v2094_v51, %v1306_v52  ;;  %v2007_v14 = vpop.f32.mrb[17].mxu1 }
 0x6cd   :  { %2011 = vmatmul.mubr.msk.f32.vlgmr.msra.gmra.mrb[6].mxu0 %vm162_vm2, %v1313_v53 }
 0x6ce   :  { %2019 = vmatpush3.xpose.msk.msra.mxu0 %vm162_vm2, %v1479_v54  ;;  %2020 = vmatprep.mubr.msk.f32.mxu0 %vm2203_vm1, %v2202_v8 }
 0x6cf   :  { %2028 = vmatprep.subr.mxu0 %v2202_v8 }
 0x6d1   :  { %2021 = vmatmul.mubr.msk.f32.vlgmr.msra.gmra.mrb[10].mxu0 %vm162_vm2, %v1477_v55 }
 0x6d2   :  { %2030 = vmatprep.mubr.msk.f32.mxu0 %vm2203_vm1, %v2202_v8 }
 0x759   :  { %v1472_v56 = vpop.f32.mrb[18].mxu1 }
 0x75a   :  { %v2017_v57 = vpop.f32.mrb[19].mxu1  ;;  %v1554_v58 = vsel %vm162_vm2, %v1472_v56, -inf }
 0x75b   :  { %1555 = vmax.xlane.f32.xlu0 %v1554_v58 }
 0x771   :  { %1572 = vrot.lane.b32.xlu0 %v2309_v12, %s2214_s16 }
 0x7a4   :  { %v1550_v59 = vpop.f32.mrb[10].mxu0 }
 0x7a5   :  { %v2022_v60 = vpop.f32.mrb[11].mxu0  ;;  %v1557_v61 = vsel %vm162_vm2, %v1550_v59, -inf }
 0x7a6   :  { %1558 = vmax.xlane.f32.xlu1 %v1557_v61 }
 0x7b7   :  { %1648 = vrot.lane.b32.xlu1 %v2312_v13, %s2214_s16 }
 0x7e8   :  { %v1556_v62 = vpop.xlane.xlu0 %1555 }
 0x7e9   :  { %v1560_v63 = vsub.f32 %v1472_v56, %v1556_v62 }
 0x7eb   :  { %v1562_v0 = vmul.f32 1.442695, %v1560_v63 }
 0x7ec   :  { %v1573_v1 = vpop.permute.xlu0 %1572 }
 0x7ed   :  { %2095 = vpow2.f32 %v1562_v0  ;;  %2024 = vmatpush3.msra.mxu1 %v1573_v1 }
 0x7f7   :  { %v2096_v8 = vpop.eup %2095 }
 0x7f8   :  { %2026 = vmatmul.mubr.msk.f32.vlgmr.msra.gmra.mrb[20].mxu1 %vm162_vm2, %v2096_v8  ;;  %v1566_v2 = vsel %vm162_vm2, %v2096_v8, 0.0 }
 0x7f9   :  { %1567 = vadd.xlane.f32.xlu0 %v1566_v2 }
 0x833   :  { %v1559_v12 = vpop.xlane.xlu1 %1558 }
 0x834   :  { %v1561_v3 = vsub.f32 %v1550_v59, %v1559_v12 }
 0x836   :  { %v1564_v4 = vmul.f32 1.442695, %v1561_v3 }
 0x837   :  { %v1649_v5 = vpop.permute.xlu1 %1648 }
 0x838   :  { %2097 = vpow2.f32 %v1564_v4  ;;  %2029 = vmatpush3.msra.mxu0 %v1649_v5 }
 0x839   :  { %2033 = vmatprep.subr.mxu0 %v1728_v7 }
 0x842   :  { %v2098_v6 = vpop.eup %2097 }
 0x843   :  { %2031 = vmatmul.mubr.msk.f32.vlgmr.msra.gmra.mrb[12].mxu0 %vm162_vm2, %v2098_v6  ;;  %v1569_v13 = vsel %vm162_vm2, %v2098_v6, 0.0 }
 0x844   :  { %1570 = vadd.xlane.f32.xlu1 %v1569_v13  ;;  %2034 = vmatpush3.msra.mxu0 %v1728_v7 }
 0x886   :  { %v1568_v9 = vpop.xlane.xlu0 %1567 }
 0x887   :  { %2099 = vrcp.f32 %v1568_v9 }
 0x891   :  { %v2100_v10 = vpop.eup %2099 }
 0x8cb   :  { %v1644_v11 = vpop.f32.mrb[20].mxu1 }
 0x8cc   :  { %v1726_v16 = vmul.f32 %v2100_v10, %v1644_v11  ;;  %v2027_v17 = vpop.f32.mrb[21].mxu1 }
 0x8ce   :  { %2035 = vmatprep.mubr.msk.f32.mxu0 %vm162_vm2, %v1726_v16 }
 0x8d1   :  { %v1571_v18 = vpop.xlane.xlu1 %1570 }
 0x8d2   :  { %2101 = vrcp.f32 %v1571_v18 }
 0x8dc   :  { %v2102_v19 = vpop.eup %2101 }
 0x916   :  { %v1720_v20 = vpop.f32.mrb[12].mxu0 }
 0x917   :  { %v1727_v21 = vmul.f32 %v2102_v19, %v1720_v20  ;;  %v2032_v22 = vpop.f32.mrb[13].mxu0 }
 0x919   :  { %2036 = vmatmul.mubr.msk.f32.vlgmr.msra.gmra.mrb[6].mxu0 %vm162_vm2, %v1727_v21 }
 0x9ec   :  { %v2037_v24 = vpop.f32.mrb[6].mxu0 }
 0x9ed   :  { %v1820_v25 = vadd.f32 %v2037_v24, %v1876_v23  ;;  %v1801_v26 = vpop.f32.mrb[7].mxu0 }
 0x9ee   :  { %v1819_v27 = vadd.f32 %v1876_v23, %v1801_v26 }
 0x9ef   :  { %1822 = vst.msk [vmem:[#allocation8 + $0x8] sm:$0xff] %vm75_vm0, %v1820_v25 }
 0x9f0   :  { %1821 = vst.msk [vmem:[#allocation8] sm:$0xff] %vm75_vm0, %v1819_v27 }
 0x9f1   :  { %2180 = shalt.err (!%p2177_p0)
}
 0x9f2   :  { %s2181_s23 = scalar_lea.hbm %s2470_s5, 256 }
 0x9f3   :  { %p2182_p1 = scmp.ne.s32.totalorder %s2470_s5, %s2181_s23  ;;  %p2185_p2 = scmp.lt.u32.totalorder %s2181_s23, %s2470_s5 }
 0x9f5   :  { %p2187_p3 = pnand %p2185_p2, %p2182_p1 }
 0x9f7   :  { %2190 = shalt.err (!%p2187_p3)
}
 0x9f8   :  { %1834 = dma.vmem_to_hbm [thread:$0]  %s1829_s19, 256, %s2470_s5, [#allocation4], %s2199_s30, %s2199_s30, %s2200_s6  }
 0x9f9   :  { %2195 = dma.done.wait [#allocation4], 256  }
 0x9fa   :  { %2196 = vsyncadd [#allocation4], 4294967040 }
 0x9fb   :  { %1838 = vsyncpa [#allocation3], 1 }
 0x9fc   :  { %1839 = vsyncpa [#allocation6], 1 }
 0x9fd   :  { %1840 = vsyncpa [#allocation4], 1 }

</bundles_post_ra>
